<compile_context>
chip_gen: v6e
topology: v6e:2x2x1
jax: 0.10.0
libtpu: 0.0.40
codegen_flags: <defaults>
</compile_context>

<pallas_src>
import jax
import jax.numpy as jnp
from jax.experimental import pallas as pl
from jax.experimental.pallas import tpu as pltpu

B_CONST = 4.0            # self.b = 4 in the PyTorch module
LANES = 128
TARGET_STEPS = 8         # aim for >= 8 grid steps once the input is big enough
MIN_BLOCK_BYTES = 64 * 1024   # below this, per-step overhead dominates


def _squareplus_kernel(x_ref, o_ref):
    # Upcast to f32 for the square/sqrt (no-op for f32 inputs), cast at store.
    x = x_ref[...].astype(jnp.float32)
    o_ref[...] = (0.5 * (x + jnp.sqrt(x * x + B_CONST))).astype(o_ref.dtype)


def _chip_config():
    """(max_block_bytes, vmem_limit_bytes) tuned per TPU generation."""
    kind = ""
    try:
        kind = jax.devices()[0].device_kind.lower()
    except Exception:
        pass
    if "v6" in kind:              # v6e: 128 MiB physical VMEM, ~1.4 TB/s HBM
        return 8 << 20, 48 << 20
    if "7" in kind:               # v7x: 64 MiB physical VMEM, ~3.2 TB/s HBM
        return 6 << 20, 40 << 20
    if "v5" in kind:              # v5e: raise the 16 MiB scoped default a bit
        return 4 << 20, 24 << 20
    return 4 << 20, 32 << 20      # unknown generation: safe everywhere


def _block_rows_for(rows, lanes, itemsize, max_block_bytes):
    """Sublane-aligned row block giving ~TARGET_STEPS pipeline steps."""
    sublane = max(8, 32 // itemsize)      # 8 f32 / 16 bf16 / 32 int8 packing
    if rows <= sublane:
        return rows                        # full-extent block (always legal)
    n_bytes = rows * lanes * itemsize
    tgt = min(max_block_bytes,
              max(MIN_BLOCK_BYTES, pl.cdiv(n_bytes, TARGET_STEPS)))
    br = (tgt // (lanes * itemsize)) // sublane * sublane
    br = max(sublane, min(br, (rows // sublane) * sublane))
    return br


def _run(x2d, block_rows, lanes, vmem_limit):
    rows = x2d.shape[0]
    grid = pl.cdiv(rows, block_rows)      # partial last block clipped/masked
    itemsize = jnp.dtype(x2d.dtype).itemsize
    return pl.pallas_call(
        _squareplus_kernel,
        out_shape=jax.ShapeDtypeStruct((rows, lanes), x2d.dtype),
        grid_spec=pltpu.PrefetchScalarGridSpec(
            num_scalar_prefetch=0,
            grid=(grid,),
            in_specs=[pl.BlockSpec((block_rows, lanes), lambda i: (i, 0))],
            out_specs=pl.BlockSpec((block_rows, lanes), lambda i: (i, 0)),
        ),
        compiler_params=pltpu.CompilerParams(
            dimension_semantics=("parallel",),
            vmem_limit_bytes=vmem_limit,
        ),
        cost_estimate=pl.CostEstimate(
            flops=4 * rows * lanes,
            transcendentals=rows * lanes,
            bytes_accessed=2 * rows * lanes * itemsize,
        ),
    )(x2d)


def squareplus(x: jax.Array) -> jax.Array:
    """Applies 0.5 * (x + sqrt(x*x + 4)) elementwise, matching SquarePlus."""
    orig_shape = x.shape
    dtype = x.dtype
    n = x.size
    if n == 0:
        return x
    itemsize = jnp.dtype(dtype).itemsize
    max_block_bytes, vmem_limit = _chip_config()
    last = orig_shape[-1] if x.ndim >= 1 else 1

    # Fast path: no pad, no flatten/relayout, no output slice. Block directly
    # over the collapsed (prod(leading), last) view whenever the last dim is
    # lane-aligned, or wide enough that a single masked lane-group on the
    # ragged tail is cheaper than a full relayout pass over the tensor.
    if (x.ndim >= 2
            and (last % LANES == 0 or last >= 4 * LANES)
            and 8 * last * itemsize <= max_block_bytes):
        rows = n // last
        x2d = jnp.reshape(x, (rows, last))      # leading-dim collapse only
        block_rows = _block_rows_for(rows, last, itemsize, max_block_bytes)
        out2d = _run(x2d, block_rows, last, vmem_limit)
        return jnp.reshape(out2d, orig_shape)

    # Generic path: flatten, use the widest lane count that divides n exactly
    # so the pad / trailing slice only exists for awkward sizes (<=127 elems).
    for lanes in (4 * LANES, 2 * LANES, LANES):
        if n % lanes == 0:
            pad = 0
            break
    else:
        lanes = LANES
        pad = (-n) % LANES                       # <= 127 elements

    x_flat = jnp.reshape(x, (-1,))
    if pad:
        x_flat = jnp.pad(x_flat, (0, pad))
    rows = (n + pad) // lanes
    x2d = jnp.reshape(x_flat, (rows, lanes))
    block_rows = _block_rows_for(rows, lanes, itemsize, max_block_bytes)
    out2d = _run(x2d, block_rows, lanes, vmem_limit)

    out_flat = jnp.reshape(out2d, (-1,))
    if pad:
        # squareplus(0) = 1 on the padded tail must not leak into the result.
        out_flat = out_flat[:n]
    return jnp.reshape(out_flat, orig_shape)


if __name__ == "__main__":
    key = jax.random.PRNGKey(0)

    def ref(v):
        return 0.5 * (v + jnp.sqrt(v * v + 4.0))

    # Primary check: NCHW input like the PyTorch module would see.
    x = jax.random.normal(key, (2, 4, 16, 16), dtype=jnp.float32)
    y = jax.block_until_ready(squareplus(x))
    assert y.shape == x.shape and y.dtype == x.dtype
    assert jnp.allclose(y, ref(x), atol=1e-6, rtol=1e-6)

    # Docstring example values.
    ex = jnp.array([[1.0, 2.0], [3.0, 4.0]], dtype=jnp.float32)
    ex_out = jax.block_until_ready(squareplus(ex))
    ex_ref = jnp.array([[1.6180, 2.4142], [3.3028, 4.2361]], dtype=jnp.float32)
    assert jnp.allclose(ex_out, ex_ref, atol=1e-3)

    # Unaligned size (exercises the generic padded path).
    x_odd = jax.random.normal(key, (3, 5, 7), dtype=jnp.float32)
    y_odd = jax.block_until_ready(squareplus(x_odd))
    assert jnp.allclose(y_odd, ref(x_odd), atol=1e-6, rtol=1e-6)

    # Lane-aligned last dim (fast path, multi-block grid).
    x_al = jax.random.normal(key, (2, 4, 16, 256), dtype=jnp.float32)
    y_al = jax.block_until_ready(squareplus(x_al))
    assert jnp.allclose(y_al, ref(x_al), atol=1e-6, rtol=1e-6)

    # Wide but non-128-multiple last dim (fast path, ragged lanes, grid > 1).
    x_w = jax.random.normal(key, (256, 1000), dtype=jnp.float32)
    y_w = jax.block_until_ready(squareplus(x_w))
    assert jnp.allclose(y_w, ref(x_w), atol=1e-6, rtol=1e-6)

    # bf16 input: computed in f32 in-kernel, cast back at the store.
    x_bf = jax.random.normal(key, (4, 256), dtype=jnp.bfloat16)
    y_bf = jax.block_until_ready(squareplus(x_bf))
    assert y_bf.dtype == jnp.bfloat16
    assert jnp.allclose(y_bf.astype(jnp.float32),
                        ref(x_bf.astype(jnp.float32)), atol=2e-2, rtol=2e-2)

    print("KERNEL_OK")
</pallas_src>

<mosaic_0001>
module attributes {stable_mosaic.version = 11 : i64} {
  func.func @_squareplus_kernel(%arg0: i32, %arg1: memref<4x512xf32, #tpu.memory_space<vmem>>, %arg2: memref<4x512xf32, #tpu.memory_space<vmem>>) attributes {dimension_semantics = [#tpu.dimension_semantics<parallel>], iteration_bounds = array<i64: 1>, scalar_prefetch = 0 : i64, scratch_operands = 0 : i64, tpu.core_type = #tpu.core_type<tc>, window_params = [{transform_indices = @transform_0, window_bounds = array<i64: 4, 512>}, {transform_indices = @transform_1, window_bounds = array<i64: 4, 512>}]} {
    %c0 = arith.constant 0 : index
    %c0_0 = arith.constant 0 : index
    %0 = vector.load %arg1[%c0, %c0_0] : memref<4x512xf32, #tpu.memory_space<vmem>>, vector<4x512xf32>
    %1 = arith.mulf %0, %0 : vector<4x512xf32>
    %cst = arith.constant 4.000000e+00 : f32
    %2 = vector.broadcast %cst : f32 to vector<4x512xf32>
    %3 = arith.addf %1, %2 : vector<4x512xf32>
    %4 = math.sqrt %3 : vector<4x512xf32>
    %5 = arith.addf %0, %4 : vector<4x512xf32>
    %cst_1 = arith.constant 5.000000e-01 : f32
    %6 = vector.broadcast %cst_1 : f32 to vector<4x512xf32>
    %7 = arith.mulf %6, %5 : vector<4x512xf32>
    %c0_2 = arith.constant 0 : index
    %c0_3 = arith.constant 0 : index
    %8 = vector.load %arg2[%c0_2, %c0_3] : memref<4x512xf32, #tpu.memory_space<vmem>>, vector<4x512xf32>
    tpu.vector_store %arg2[%c0_2, %c0_3], %7 {strides = array<i32>} : memref<4x512xf32, #tpu.memory_space<vmem>>, vector<4x512xf32>,
    return
  }
  func.func @transform_0(%arg0: i32) -> (i32, i32) {
    %c0_i32 = arith.constant 0 : i32
    %c0_i32_0 = arith.constant 0 : i32
    return %arg0, %c0_i32 : i32, i32
  }
  func.func @transform_1(%arg0: i32) -> (i32, i32) {
    %c0_i32 = arith.constant 0 : i32
    %c0_i32_0 = arith.constant 0 : i32
    return %arg0, %c0_i32 : i32, i32
  }
}

</mosaic_0001>

<bundles_post_ra>
// kernel: tpu_custom_call.1
= control target key start
LH: loop header
LB: loop body
LE: loop exit
PB: predicated region body
PF: predicated region fallthrough
CT: control target
= control target key end

     0   :  { %6 = vsyncpa [#allocation3], 0  ;;  %s130_s0 = inlined_call_operand.hbm [shape: f32[4,512], index: 0, kind: input, shape index: {}]   ;;  %s131_s1 = inlined_call_operand.hbm [shape: f32[4,512], index: 1, kind: output, shape index: {}]  }
   0x1   :  { %7 = vsyncpa [#allocation4], 0  ;;  %s112_s6 = smov [#allocation2]  }
   0x2   :  { %s14_s7 = sshll.u32 %s112_s6, 4  ;;  %s15_s7 = int_to_ptr.vmem [resolvable:$true] %s14_s7 }
   0x3   :  { %s76_s8 = scalar_lea.vmem %s15_s7, 256  ;;  %p81_p1 = scmp.lt.s32.totalorder %s15_s7, %s15_s7 }
   0x4   :  { %p77_p0 = scmp.ne.s32.totalorder %s15_s7, %s76_s8  ;;  %p82_p2 = scmp.lt.s32.totalorder %s76_s8, %s76_s8 }
   0x6   :  { %p83_p3 = por %p82_p2, %p81_p1 }
   0x8   :  { %p84_p4 = pnand %p83_p3, %p77_p0 }
   0xa   :  { %87 = shalt.err (!%p84_p4)
}
   0xb   :  { %17 = dma.hbm_to_vmem [thread:$0]  %s130_s0, 256, %s15_s7, [#allocation3]  }
   0xc   :  { %108 = dma.done.wait [#allocation3], 256  }
   0xd   :  { %109 = vsyncadd [#allocation3], 4294967040  ;;  %v21_v0 = vld [vmem:[#allocation2] sm:$0xff]  ;;  %v22_v1 = vld [vmem:[#allocation2 + $0x8] sm:$0xff]  ;;  %s113_s0 = smov [#allocation5]  }
   0xe   :  { %v23_v2 = vmul.f32 %v21_v0, %v21_v0  ;;  %v24_v3 = vmul.f32 %v22_v1, %v22_v1  ;;  %s53_s11 = sshll.u32 %s113_s0, 4  ;;  %s54_s11 = int_to_ptr.vmem [resolvable:$true] %s53_s11 }
   0xf   :  { %s88_s12 = scalar_lea.vmem %s54_s11, 256  ;;  %p93_p6 = scmp.lt.s32.totalorder %s54_s11, %s54_s11 }
  0x10   :  { %v25_v4 = vadd.f32 4.0, %v23_v2  ;;  %v26_v5 = vadd.f32 4.0, %v24_v3  ;;  %p89_p5 = scmp.ne.s32.totalorder %s54_s11, %s88_s12  ;;  %p94_p7 = scmp.lt.s32.totalorder %s88_s12, %s88_s12 }
  0x12   :  { %64 = vrsqrt.f32 %v25_v4  ;;  %vm29_vm0 = vcmp.eq.f32.partialorder %v25_v4, inf  ;;  %v32_v7 = vand.u32 2147483648, %v25_v4  ;;  %vm31_vm1 = vcmp.eq.f32.partialorder %v25_v4, 0.0  ;;  %p95_p8 = por %p94_p7, %p93_p6 }
  0x13   :  { %66 = vrsqrt.f32 %v26_v5  ;;  %vm36_vm2 = vcmp.eq.f32.partialorder %v26_v5, inf  ;;  %v39_v10 = vand.u32 2147483648, %v26_v5  ;;  %vm38_vm3 = vcmp.eq.f32.partialorder %v26_v5, 0.0 }
  0x14   :  { %p96_p9 = pnand %p95_p8, %p89_p5 }
  0x1f   :  { %v65_v6 = vpop.eup %64 }
  0x20   :  { %v67_v8 = vpop.eup %66  ;;  %v28_v9 = vmul.f32 %v65_v6, %v25_v4 }
  0x21   :  { %v35_v11 = vmul.f32 %v67_v8, %v26_v5 }
  0x22   :  { %v30_v12 = vsel %vm29_vm0, %v25_v4, %v28_v9 }
  0x23   :  { %v33_v13 = vsel %vm31_vm1, %v32_v7, %v30_v12  ;;  %v37_v14 = vsel %vm36_vm2, %v26_v5, %v35_v11 }
  0x24   :  { %v41_v15 = vadd.f32 %v33_v13, %v21_v0  ;;  %v40_v16 = vsel %vm38_vm3, %v39_v10, %v37_v14 }
  0x25   :  { %v42_v17 = vadd.f32 %v40_v16, %v22_v1 }
  0x26   :  { %v43_v18 = vmul.f32 0.5, %v41_v15 }
  0x27   :  { %v44_v19 = vmul.f32 0.5, %v42_v17 }
  0x28   :  { %45 = vst [vmem:[#allocation5] sm:$0xff] %v43_v18 }
  0x29   :  { %46 = vst [vmem:[#allocation5 + $0x8] sm:$0xff] %v44_v19 }
  0x2a   :  { %99 = shalt.err (!%p96_p9)
}
  0x2b   :  { %56 = dma.vmem_to_hbm [thread:$0]  %s54_s11, 256, %s131_s1, [#allocation4]  }
  0x2c   :  { %110 = dma.done.wait [#allocation4], 256  }
  0x2d   :  { %111 = vsyncadd [#allocation4], 4294967040 }
  0x2e   :  { %60 = vsyncpa [#allocation3], 1 }
  0x2f   :  { %61 = vsyncpa [#allocation4], 1 }

</bundles_post_ra>
